<compile_context>
chip_gen: v5e
topology: v5e:2x2
jax: 0.10.0
libtpu: 0.0.40
codegen_flags: <defaults>
</compile_context>

<pallas_src>
import jax
import jax.numpy as jnp
from jax.experimental import pallas as pl
from jax.experimental.pallas import tpu as pltpu


# ----------------------------------------------------------------------------
# Small helpers
# ----------------------------------------------------------------------------
def _round_up(x, m):
    return (x + m - 1) // m * m


def _cdiv(a, b):
    return (a + b - 1) // b


def _row_granularity(dtype):
    # Sub-32-bit dtypes pack rows along sublanes: keep whole packed rows.
    isz = jnp.dtype(dtype).itemsize
    if isz >= 4:
        return 8
    if isz == 2:
        return 16
    return 32


def _default_compute_dtype(dtype):
    # f32 MXU operands waste throughput and double DMA bytes on v6e/v7x;
    # bf16 operands + f32 accumulation is the intended fast path.
    if jnp.dtype(dtype) == jnp.dtype(jnp.float32):
        return jnp.dtype(jnp.bfloat16)
    return jnp.dtype(dtype)


def _largest_divisor_tile(dim, cap):
    """Largest multiple of 128 dividing `dim` (itself a multiple of 128), <= cap."""
    cap = max(128, min(cap, dim))
    best, t = 128, 128
    while t <= cap:
        if dim % t == 0:
            best = t
        t += 128
    return best


def _vmem_budget_bytes():
    """Physical-VMEM-aware scoped-VMEM ceiling (leave headroom for Mosaic)."""
    phys = 64 << 20
    try:
        info = pltpu.get_tpu_info()
        phys = int(getattr(info, "vmem_capacity_bytes", phys) or phys)
    except Exception:
        pass
    if phys >= (128 << 20):      # v5e / v6e: 128 MiB physical VMEM
        return 96 << 20
    return 48 << 20              # v7x: 64 MiB per TensorCore


# ----------------------------------------------------------------------------
# Kernel bodies
# ----------------------------------------------------------------------------
def _mlp_kernel_single_k(x_ref, w_ref, b_ref, o_ref):
    # Whole reduction in one tile: dot + bias + tanh straight to the output.
    y = jnp.dot(x_ref[...], w_ref[...], preferred_element_type=jnp.float32)
    y = y + b_ref[...].astype(jnp.float32)
    o_ref[...] = jnp.tanh(y).astype(o_ref.dtype)


def _mlp_kernel_multi_k(x_ref, w_ref, b_ref, o_ref, acc_ref):
    # grid = (M tiles, N tiles, K tiles); K (reduction) is last / "arbitrary".
    k = pl.program_id(2)

    @pl.when(k == 0)
    def _():
        acc_ref[...] = jnp.zeros_like(acc_ref)

    acc_ref[...] += jnp.dot(x_ref[...], w_ref[...],
                            preferred_element_type=jnp.float32)

    @pl.when(k == pl.num_programs(2) - 1)
    def _():
        y = acc_ref[...] + b_ref[...].astype(jnp.float32)
        o_ref[...] = jnp.tanh(y).astype(o_ref.dtype)


# ----------------------------------------------------------------------------
# Parameter preparation (run ONCE at init time, not per call)
# ----------------------------------------------------------------------------
def prepare_mlp_params(weight, bias, compute_dtype=None):
    """One-time transform of nn.Linear parameters.

    weight: (H_out, H_in) in nn.Linear layout; bias: (H_out,).
    Returns a dict with the weight cast to compute_dtype, transposed to (K, N)
    and zero-padded to lane-dense multiples of 128, plus a (1, Np) f32 bias.
    """
    H_out, H_in = weight.shape
    assert bias.shape == (H_out,)
    cdt = (_default_compute_dtype(weight.dtype) if compute_dtype is None
           else jnp.dtype(compute_dtype))

    Kp = _round_up(H_in, 128)
    Np = _round_up(H_out, 128)

    w_t = jnp.asarray(weight).T.astype(cdt)          # (H_in, H_out) = (K, N)
    if (H_in, H_out) != (Kp, Np):
        w_p = jnp.zeros((Kp, Np), cdt).at[:H_in, :H_out].set(w_t)
    else:
        w_p = w_t
    b_p = jnp.zeros((1, Np), jnp.float32).at[0, :H_out].set(
        jnp.asarray(bias).astype(jnp.float32))

    return {"w": w_p, "b": b_p, "h_in": H_in, "h_out": H_out,
            "compute_dtype": cdt}


# ----------------------------------------------------------------------------
# Forward pass
# ----------------------------------------------------------------------------
def mlp_layer_prepared(features, params, *, tile_m=None, tile_n=None,
                       tile_k=None, w_buffers=None):
    """tanh(features @ W.T + b) using params from prepare_mlp_params."""
    B, H_in = features.shape
    assert H_in == params["h_in"]
    H_out = params["h_out"]
    w_p, b_p = params["w"], params["b"]
    Kp, Np = w_p.shape
    cdt = params["compute_dtype"]
    out_dtype = features.dtype

    g = _row_granularity(cdt)
    vmem_cap = _vmem_budget_bytes()
    m_cap = 1024 if vmem_cap > (48 << 20) else 512

    # ----- tile_m: (nearly) divide the row-granularity-padded batch.
    Bp0 = _round_up(B, g)
    if tile_m is None:
        if Bp0 <= m_cap:
            tile_m = Bp0
        else:
            num_m = _cdiv(Bp0, m_cap)
            tile_m = _round_up(_cdiv(Bp0, num_m), g)
    tile_m = max(g, _round_up(min(tile_m, Bp0), g))
    Bp = _round_up(Bp0, tile_m)

    # ----- tile_n / tile_k: lane-dense divisors of the padded dims.
    auto_n = tile_n is None
    if auto_n:
        tile_n = _largest_divisor_tile(Np, 1024)
    if tile_k is None:
        tile_k = _largest_divisor_tile(Kp, 1024)

    # v7x megacore: guarantee >=2 parallel grid tiles when N allows it.
    if auto_n and (Bp // tile_m) * (Np // tile_n) == 1 and Np >= 256:
        tile_n = _largest_divisor_tile(Np, Np // 2)

    grid_m, grid_n, grid_k = Bp // tile_m, Np // tile_n, Kp // tile_k

    # ----- x: pad / cast only when actually needed (skip extra HBM pass).
    if (Bp, Kp) == (B, H_in) and features.dtype == cdt:
        x_p = features
    else:
        x_p = jnp.zeros((Bp, Kp), cdt).at[:B, :H_in].set(features.astype(cdt))

    # ----- VMEM budget: buffered tiles + resident f32 accumulator.
    in_isz = jnp.dtype(cdt).itemsize
    out_isz = jnp.dtype(out_dtype).itemsize
    n_wbuf = w_buffers if w_buffers is not None else 2
    vmem_est = (2 * tile_m * tile_k * in_isz
                + n_wbuf * tile_k * tile_n * in_isz
                + 2 * tile_n * 4
                + 2 * tile_m * tile_n * out_isz
                + (tile_m * tile_n * 4 if grid_k > 1 else 0))
    vmem_limit = int(min(max(2 * vmem_est, 16 << 20), vmem_cap))

    w_spec_kwargs = {}
    if w_buffers is not None and w_buffers != 2:
        w_spec_kwargs["pipeline_mode"] = pl.Buffered(w_buffers)

    if grid_k == 1:
        # Fast path: single K step, no accumulator scratch.
        out_p = pl.pallas_call(
            _mlp_kernel_single_k,
            out_shape=jax.ShapeDtypeStruct((Bp, Np), out_dtype),
            grid_spec=pltpu.PrefetchScalarGridSpec(
                num_scalar_prefetch=0,
                grid=(grid_m, grid_n),
                in_specs=[
                    pl.BlockSpec((tile_m, Kp), lambda i, j: (i, 0)),      # x
                    pl.BlockSpec((Kp, tile_n), lambda i, j: (0, j),       # W (K,N)
                                 **w_spec_kwargs),
                    pl.BlockSpec((1, tile_n), lambda i, j: (0, j)),       # bias
                ],
                out_specs=pl.BlockSpec((tile_m, tile_n), lambda i, j: (i, j)),
            ),
            compiler_params=pltpu.CompilerParams(
                dimension_semantics=("parallel", "parallel"),
                vmem_limit_bytes=vmem_limit,
            ),
        )(x_p, w_p, b_p)
    else:
        out_p = pl.pallas_call(
            _mlp_kernel_multi_k,
            out_shape=jax.ShapeDtypeStruct((Bp, Np), out_dtype),
            grid_spec=pltpu.PrefetchScalarGridSpec(
                num_scalar_prefetch=0,
                grid=(grid_m, grid_n, grid_k),
                in_specs=[
                    pl.BlockSpec((tile_m, tile_k), lambda i, j, k: (i, k)),   # x
                    pl.BlockSpec((tile_k, tile_n), lambda i, j, k: (k, j),    # W (K,N)
                                 **w_spec_kwargs),
                    pl.BlockSpec((1, tile_n), lambda i, j, k: (0, j)),        # bias
                ],
                out_specs=pl.BlockSpec((tile_m, tile_n), lambda i, j, k: (i, j)),
                scratch_shapes=[pltpu.VMEM((tile_m, tile_n), jnp.float32)],
            ),
            compiler_params=pltpu.CompilerParams(
                dimension_semantics=("parallel", "parallel", "arbitrary"),
                vmem_limit_bytes=vmem_limit,
            ),
        )(x_p, w_p, b_p)

    if (Bp, Np) == (B, H_out):
        return out_p
    return out_p[:B, :H_out]


def mlp_layer(features, weight, bias, *, compute_dtype=None, **kwargs):
    """Convenience wrapper: tanh(features @ weight.T + bias).

    For repeated calls, call prepare_mlp_params once at init and use
    mlp_layer_prepared to avoid re-padding / re-casting W per call.
    """
    params = prepare_mlp_params(weight, bias, compute_dtype=compute_dtype)
    return mlp_layer_prepared(features, params, **kwargs)


# ----------------------------------------------------------------------------
# Self-test
# ----------------------------------------------------------------------------
if __name__ == "__main__":
    key = jax.random.PRNGKey(0)
    k_x, k_w, k_b, k_x2, k_w2, k_b2 = jax.random.split(key, 6)

    # --- Test 1: native MLPLayer size (CLS head), exact f32 compute path. ----
    batch, hidden = 8, 32
    features = jax.random.normal(k_x, (batch, hidden), dtype=jnp.float32)
    weight = jax.random.normal(k_w, (hidden, hidden), dtype=jnp.float32) * 0.05
    bias = jax.random.normal(k_b, (hidden,), dtype=jnp.float32) * 0.01

    out = jax.block_until_ready(
        mlp_layer(features, weight, bias, compute_dtype=jnp.float32))
    ref = jnp.tanh(features @ weight.T + bias)
    assert out.shape == (batch, hidden)
    assert jnp.allclose(out, ref, atol=1e-5, rtol=1e-5)

    # --- Test 2: default bf16 MXU operands (f32 accumulation), prepared params,
    #     N-tiling path (hidden not a single 128-lane tile). ------------------
    batch2, hidden2 = 16, 384
    f2 = jax.random.normal(k_x2, (batch2, hidden2), dtype=jnp.float32)
    w2 = jax.random.normal(k_w2, (hidden2, hidden2), dtype=jnp.float32) * 0.05
    b2 = jax.random.normal(k_b2, (hidden2,), dtype=jnp.float32) * 0.01

    params2 = prepare_mlp_params(w2, b2)                 # once, at "init" time
    out2 = jax.block_until_ready(mlp_layer_prepared(f2, params2))
    ref2_bf16 = jnp.tanh(
        jnp.dot(f2.astype(jnp.bfloat16), w2.T.astype(jnp.bfloat16),
                preferred_element_type=jnp.float32) + b2)
    ref2_f32 = jnp.tanh(f2 @ w2.T + b2)
    assert out2.shape == (batch2, hidden2)
    assert jnp.allclose(out2, ref2_bf16, atol=2e-3, rtol=2e-3)
    assert jnp.allclose(out2, ref2_f32, atol=3e-2, rtol=3e-2)

    # --- Test 3: force the K-reduction (multi-K accumulator) kernel path. ----
    out3 = jax.block_until_ready(
        mlp_layer_prepared(f2, params2, tile_k=128, tile_n=128))
    assert out3.shape == (batch2, hidden2)
    assert jnp.allclose(out3, ref2_bf16, atol=2e-3, rtol=2e-3)

    print("KERNEL_OK")
</pallas_src>

<mosaic_0001>
module attributes {stable_mosaic.version = 11 : i64} {
  func.func @_mlp_kernel_single_k(%arg0: i32, %arg1: i32, %arg2: memref<8x128xf32, #tpu.memory_space<vmem>>, %arg3: memref<128x128xf32, #tpu.memory_space<vmem>>, %arg4: memref<1x128xf32, #tpu.memory_space<vmem>>, %arg5: memref<8x128xf32, #tpu.memory_space<vmem>>) attributes {dimension_semantics = [#tpu.dimension_semantics<parallel>, #tpu.dimension_semantics<parallel>], iteration_bounds = array<i64: 1, 1>, scalar_prefetch = 0 : i64, scratch_operands = 0 : i64, tpu.core_type = #tpu.core_type<tc>, window_params = [{transform_indices = @transform_0, window_bounds = array<i64: 8, 128>}, {transform_indices = @transform_1, window_bounds = array<i64: 128, 128>}, {transform_indices = @transform_2, window_bounds = array<i64: 1, 128>}, {transform_indices = @transform_3, window_bounds = array<i64: 8, 128>}]} {
    %c0 = arith.constant 0 : index
    %c0_0 = arith.constant 0 : index
    %0 = vector.load %arg2[%c0, %c0_0] : memref<8x128xf32, #tpu.memory_space<vmem>>, vector<8x128xf32>
    %c0_1 = arith.constant 0 : index
    %c0_2 = arith.constant 0 : index
    %1 = vector.load %arg3[%c0_1, %c0_2] : memref<128x128xf32, #tpu.memory_space<vmem>>, vector<128x128xf32>
    %cst = arith.constant dense<0.000000e+00> : vector<8x128xf32>
    %2 = tpu.matmul %0, %1, %cst {dimension_numbers = #tpu.dot_dimension_numbers<[1], [0], [0], [1], [0, 0, 1, 1], [], []>} : vector<8x128xf32>, vector<128x128xf32>, vector<8x128xf32> -> vector<8x128xf32>
    %c0_3 = arith.constant 0 : index
    %c0_4 = arith.constant 0 : index
    %3 = vector.load %arg4[%c0_3, %c0_4] : memref<1x128xf32, #tpu.memory_space<vmem>>, vector<1x128xf32>
    %4 = vector.broadcast %3 : vector<1x128xf32> to vector<8x128xf32>
    %5 = arith.addf %2, %4 : vector<8x128xf32>
    %6 = math.tanh %5 : vector<8x128xf32>
    %c0_5 = arith.constant 0 : index
    %c0_6 = arith.constant 0 : index
    %7 = vector.load %arg5[%c0_5, %c0_6] : memref<8x128xf32, #tpu.memory_space<vmem>>, vector<8x128xf32>
    tpu.vector_store %arg5[%c0_5, %c0_6], %6 {strides = array<i32>} : memref<8x128xf32, #tpu.memory_space<vmem>>, vector<8x128xf32>,
    return
  }
  func.func @transform_0(%arg0: i32, %arg1: i32) -> (i32, i32) {
    %c0_i32 = arith.constant 0 : i32
    %c0_i32_0 = arith.constant 0 : i32
    return %arg0, %c0_i32 : i32, i32
  }
  func.func @transform_1(%arg0: i32, %arg1: i32) -> (i32, i32) {
    %c0_i32 = arith.constant 0 : i32
    %c0_i32_0 = arith.constant 0 : i32
    return %c0_i32, %arg1 : i32, i32
  }
  func.func @transform_2(%arg0: i32, %arg1: i32) -> (i32, i32) {
    %c0_i32 = arith.constant 0 : i32
    %c0_i32_0 = arith.constant 0 : i32
    return %c0_i32, %arg1 : i32, i32
  }
  func.func @transform_3(%arg0: i32, %arg1: i32) -> (i32, i32) {
    %c0_i32 = arith.constant 0 : i32
    return %arg0, %arg1 : i32, i32
  }
}

</mosaic_0001>

<bundles_post_ra>
// kernel: tpu_custom_call.1
= control target key start
LH: loop header
LB: loop body
LE: loop exit
PB: predicated region body
PF: predicated region fallthrough
CT: control target
= control target key end

     0   :  { %8 = vsyncpa [#allocation3], 0  ;;  %s229_s0 = inlined_call_operand.hbm [shape: f32[8,128], index: 0, kind: input, shape index: {}]   ;;  %s230_s1 = inlined_call_operand.hbm [shape: f32[128,128], index: 1, kind: input, shape index: {}]   ;;  %s231_s2 = inlined_call_operand.vmem [shape: f32[1,128], index: 2, kind: input, shape index: {}]   ;;  %s232_s3 = inlined_call_operand.hbm [shape: f32[8,128], index: 3, kind: output, shape index: {}]  }
   0x1   :  { %9 = vsyncpa [#allocation6], 0 }
   0x2   :  { %10 = vsyncpa [#allocation4], 0  ;;  %s16_s14 = sshll.u32 %s229_s0, 4  ;;  %s192_s15 = smov [#allocation2]   ;;  %s17_s14 = int_to_ptr.hbm [resolvable:$true] %s16_s14 }
   0x3   :  { %s18_s16 = sshll.u32 %s192_s15, 4  ;;  %s26_s19 = sshll.u32 %s230_s1, 4  ;;  %s19_s16 = int_to_ptr.vmem [resolvable:$true] %s18_s16  ;;  %s27_s19 = int_to_ptr.hbm [resolvable:$true] %s26_s19 }
   0x4   :  { %21 = dma.hbm_to_vmem [thread:$0]  %s17_s14, 128, %s19_s16, [#allocation3]  }
   0x5   :  { %s193_s20 = smov [#allocation5]   ;;  %s194_s22 = smov 128  }
   0x6   :  { %s28_s21 = sshll.u32 %s193_s20, 4  ;;  %s195_s23 = smov 8   ;;  %s29_s21 = int_to_ptr.vmem [resolvable:$true] %s28_s21 }
   0x7   :  { %34 = dma.hbm_to_vmem [thread:$0]  %s27_s19, 2048, %s29_s21, [#allocation6], %s194_s22, %s194_s22, %s195_s23  }
   0x8   :  { %186 = dma.done.wait [#allocation3], 128  }
   0x9   :  { %187 = vsyncadd [#allocation3], 4294967168 }
   0xa   :  { %188 = dma.done.wait [#allocation6], 2048  }
   0xb   :  { %189 = vsyncadd [#allocation6], 4294965248  ;;  %v61_v0 = vld [vmem:[#allocation5 + $0x78] sm:$0xff]  ;;  %v60_v1 = vld [vmem:[#allocation5 + $0x70] sm:$0xff]  ;;  %s196_s24 = smov [#allocation7]   ;;  %s95_s28 = sshll.u32 %s232_s3, 4  ;;  %s96_s28 = int_to_ptr.hbm [resolvable:$true] %s95_s28 }
   0xc   :  { %66 = vmatpush.msra.mxu0 %v61_v0  ;;  %v59_v2 = vld [vmem:[#allocation5 + $0x68] sm:$0xff]  ;;  %v58_v3 = vld [vmem:[#allocation5 + $0x60] sm:$0xff]  ;;  %v57_v4 = vld [vmem:[#allocation5 + $0x58] sm:$0xff]  ;;  %s93_s25 = sshll.u32 %s196_s24, 4  ;;  %s94_s25 = int_to_ptr.vmem [resolvable:$true] %s93_s25 }
   0xd   :  { %v56_v5 = vld [vmem:[#allocation5 + $0x50] sm:$0xff]  ;;  %v55_v6 = vld [vmem:[#allocation5 + $0x48] sm:$0xff]  ;;  %v54_v7 = vld [vmem:[#allocation5 + $0x40] sm:$0xff] }
   0xe   :  { %67 = vmatpush.msra.mxu0 %v60_v1  ;;  %v53_v8 = vld [vmem:[#allocation5 + $0x38] sm:$0xff]  ;;  %v52_v9 = vld [vmem:[#allocation5 + $0x30] sm:$0xff]  ;;  %v51_v10 = vld [vmem:[#allocation5 + $0x28] sm:$0xff] }
   0xf   :  { %v50_v11 = vld [vmem:[#allocation5 + $0x20] sm:$0xff]  ;;  %v49_v12 = vld [vmem:[#allocation5 + $0x18] sm:$0xff]  ;;  %v48_v13 = vld [vmem:[#allocation5 + $0x10] sm:$0xff] }
  0x10   :  { %68 = vmatpush.msra.mxu0 %v59_v2  ;;  %v47_v14 = vld [vmem:[#allocation5 + $0x8] sm:$0xff]  ;;  %v46_v15 = vld [vmem:[#allocation5] sm:$0xff]  ;;  %v45_v16 = vld [vmem:[#allocation2] sm:$0xff] }
  0x11   :  { %v111_v17 = vld [vmem:[%s231_s2] ss:$0 sm:$0xff] }
  0x12   :  { %69 = vmatpush.msra.mxu0 %v58_v3 }
  0x14   :  { %70 = vmatpush.msra.mxu0 %v57_v4 }
  0x16   :  { %71 = vmatpush.msra.mxu0 %v56_v5 }
  0x18   :  { %72 = vmatpush.msra.mxu0 %v55_v6 }
  0x1a   :  { %73 = vmatpush.msra.mxu0 %v54_v7 }
  0x1c   :  { %74 = vmatpush.msra.mxu0 %v53_v8 }
  0x1e   :  { %75 = vmatpush.msra.mxu0 %v52_v9 }
  0x20   :  { %76 = vmatpush.msra.mxu0 %v51_v10 }
  0x22   :  { %77 = vmatpush.msra.mxu0 %v50_v11 }
  0x24   :  { %78 = vmatpush.msra.mxu0 %v49_v12 }
  0x26   :  { %79 = vmatpush.msra.mxu0 %v48_v13 }
  0x28   :  { %80 = vmatpush.msra.mxu0 %v47_v14 }
  0x2a   :  { %81 = vmatpush.msra.mxu0 %v46_v15 }
  0x2b   :  { %82 = vmatmul.f32.vlgmr.msra.gmra.mxu0 %v45_v16 }
  0xa8   :  { %v83_v18 = vpop.f32.mrf.mxu0 }
  0xa9   :  { %v84_v19 = vadd.f32 %v111_v17, %v83_v18 }
  0xab   :  { %112 = vtanh.f32 %v84_v19 }
  0xb1   :  { %v113_v20 = vpop.eup %112 }
  0xb2   :  { %87 = vst [vmem:[#allocation7] sm:$0xff] %v113_v20 }
  0xb3   :  { %98 = dma.vmem_to_hbm [thread:$0]  %s94_s25, 128, %s96_s28, [#allocation4]  }
  0xb4   :  { %190 = dma.done.wait [#allocation4], 128  }
  0xb5   :  { %191 = vsyncadd [#allocation4], 4294967168 }
  0xb6   :  { %103 = vsyncpa [#allocation3], 1 }
  0xb7   :  { %104 = vsyncpa [#allocation6], 1 }
  0xb8   :  { %105 = vsyncpa [#allocation4], 1 }

</bundles_post_ra>
